<compile_context>
chip_gen: v7x
topology: tpu7x:2x2x1
jax: 0.10.0
libtpu: 0.0.40
codegen_flags: <defaults>
</compile_context>

<pallas_src>
import functools

import jax
import jax.numpy as jnp
from jax.experimental import pallas as pl
from jax.experimental.pallas import tpu as pltpu

_LANE = 128
_SUBLANE = 8
_MAX_TILE_BYTES = 4 * 1024 * 1024      # ~4 MiB x-tile; double-buffered in+out ~16 MiB
_VMEM_LIMIT_BYTES = 32 * 1024 * 1024   # explicit: raises v5e's 16 MiB default, safe on v7x
_SMALL_PROBLEM_ELEMS = 1 << 18         # below this, let XLA fuse the elementwise op


def _round_up(x, m):
    return (x + m - 1) // m * m


def _gained_kernel(x_ref, theta_ref, bias_ref, o_ref, *, function):
    # x_ref: (td, tt); theta_ref/bias_ref: (td, 1) broadcast along the lane (T) axis.
    o_ref[...] = function(x_ref[...] * theta_ref[...] + bias_ref[...])


def _pallas_forward(x, theta, theta_bias, function):
    d, T = x.shape
    itemsize = jnp.dtype(x.dtype).itemsize
    max_elems = _MAX_TILE_BYTES // itemsize

    # Lane-dense tiling: grow tt (T / lane axis) first, then td, capped at ~4 MiB.
    d_pad0 = _round_up(d, _SUBLANE)
    T_pad0 = _round_up(T, _LANE)
    tt = min(T_pad0, (max_elems // _SUBLANE) // _LANE * _LANE)
    td = min(d_pad0, max(_SUBLANE, (max_elems // tt) // _SUBLANE * _SUBLANE))

    # Pad so the chosen tile divides exactly (handles ragged d / T).
    d_pad = _round_up(d, td)
    T_pad = _round_up(T, tt)
    if (d_pad, T_pad) != (d, T):
        x = jnp.pad(x, ((0, d_pad - d), (0, T_pad - T)))
        theta = jnp.pad(theta, ((0, d_pad - d), (0, 0)))
        theta_bias = jnp.pad(theta_bias, ((0, d_pad - d), (0, 0)))

    nd = d_pad // td
    nt = T_pad // tt
    kernel = functools.partial(_gained_kernel, function=function)

    if nt == 1:
        # Whole T row sweep in one tile: collapse to a 1-D grid over d. The
        # (td, 1) theta/bias blocks are fetched once per d-tile.
        grid = (nd,)
        x_spec = pl.BlockSpec((td, tt), lambda i: (i, 0))
        p_spec = pl.BlockSpec((td, 1), lambda i: (i, 0))
        semantics = ("parallel",)
    else:
        grid = (nd, nt)
        x_spec = pl.BlockSpec((td, tt), lambda i, j: (i, j))
        p_spec = pl.BlockSpec((td, 1), lambda i, j: (i, 0))   # resident across j
        semantics = ("parallel", "parallel")

    out = pl.pallas_call(
        kernel,
        out_shape=jax.ShapeDtypeStruct((d_pad, T_pad), x.dtype),
        grid_spec=pltpu.PrefetchScalarGridSpec(
            num_scalar_prefetch=0,
            grid=grid,
            in_specs=[x_spec, p_spec, p_spec],
            out_specs=x_spec,
        ),
        compiler_params=pltpu.CompilerParams(
            dimension_semantics=semantics,
            vmem_limit_bytes=_VMEM_LIMIT_BYTES,
        ),
    )(x, theta, theta_bias)

    if (d_pad, T_pad) != (d, T):
        out = out[:d, :T]
    return out


@functools.partial(jax.jit, static_argnames=("function", "use_pallas"))
def gained_function_forward(x, theta, theta_bias=None, *, function=jnp.tanh,
                            use_pallas=None):
    """Forward pass of gained_function.

    x: [d, T]; theta: [d, 1]; theta_bias: [d, 1] or None (bias=False).
    `function`: elementwise activation (static jnp callable).
    `use_pallas`: True/False/None (None = auto: Pallas only for large problems).
    """
    d, T = x.shape
    if theta_bias is None:          # bias=False in the PyTorch module -> + 0.0
        theta_bias = jnp.zeros_like(theta)
    if use_pallas is None:
        use_pallas = (d * T) >= _SMALL_PROBLEM_ELEMS
    if not use_pallas:
        # Tiny problem: a fused XLA elementwise op beats a pallas_call launch.
        return function(x * theta + theta_bias)
    return _pallas_forward(x, theta, theta_bias, function)


def init_params(key, input_dim):
    """xavier_normal_ equivalent for a (input_dim, 1) tensor.

    fan_in = 1, fan_out = input_dim, std = sqrt(2 / (fan_in + fan_out)).
    """
    k1, k2 = jax.random.split(key)
    std = (2.0 / (1 + input_dim)) ** 0.5
    theta = std * jax.random.normal(k1, (input_dim, 1), dtype=jnp.float32)
    theta_bias = std * jax.random.normal(k2, (input_dim, 1), dtype=jnp.float32)
    return theta, theta_bias


if __name__ == "__main__":
    key = jax.random.PRNGKey(0)
    kx, kp, kr = jax.random.split(key, 3)

    # Small shapes consistent with the module: input_dim d=16, sequence T=256.
    d, T = 16, 256
    x = jax.random.normal(kx, (d, T), dtype=jnp.float32)
    theta, theta_bias = init_params(kp, d)

    # Force the Pallas path so the kernel is exercised even at this small size.
    out = gained_function_forward(x, theta, theta_bias, use_pallas=True)
    out = jax.block_until_ready(out)
    ref = jnp.tanh(x * theta + theta_bias)
    assert out.shape == (d, T)
    assert jnp.allclose(out, ref, atol=1e-6, rtol=1e-6)

    # Ragged shape (not multiples of 8 / 128) to exercise the pad/slice path.
    d2, T2 = 13, 200
    x2 = jax.random.normal(kr, (d2, T2), dtype=jnp.float32)
    theta2, theta_bias2 = init_params(kp, d2)
    out2 = gained_function_forward(x2, theta2, theta_bias2, use_pallas=True)
    out2 = jax.block_until_ready(out2)
    ref2 = jnp.tanh(x2 * theta2 + theta_bias2)
    assert out2.shape == (d2, T2)
    assert jnp.allclose(out2, ref2, atol=1e-6, rtol=1e-6)

    # Auto path (small problem -> plain XLA), same semantics.
    out3 = jax.block_until_ready(gained_function_forward(x, theta, theta_bias))
    assert jnp.allclose(out3, ref, atol=1e-6, rtol=1e-6)

    print("KERNEL_OK")
</pallas_src>

<mosaic_0001>
module attributes {stable_mosaic.version = 11 : i64} {
  func.func @_gained_kernel(%arg0: i32, %arg1: memref<16x256xf32, #tpu.memory_space<vmem>>, %arg2: memref<16x1xf32, #tpu.memory_space<vmem>>, %arg3: memref<16x1xf32, #tpu.memory_space<vmem>>, %arg4: memref<16x256xf32, #tpu.memory_space<vmem>>) attributes {dimension_semantics = [#tpu.dimension_semantics<parallel>], iteration_bounds = array<i64: 1>, scalar_prefetch = 0 : i64, scratch_operands = 0 : i64, tpu.core_type = #tpu.core_type<tc>, window_params = [{transform_indices = @transform_0, window_bounds = array<i64: 16, 256>}, {transform_indices = @transform_1, window_bounds = array<i64: 16, 1>}, {transform_indices = @transform_2, window_bounds = array<i64: 16, 1>}, {transform_indices = @transform_3, window_bounds = array<i64: 16, 256>}]} {
    %c0 = arith.constant 0 : index
    %c0_0 = arith.constant 0 : index
    %0 = vector.load %arg1[%c0, %c0_0] : memref<16x256xf32, #tpu.memory_space<vmem>>, vector<16x256xf32>
    %c0_1 = arith.constant 0 : index
    %c0_2 = arith.constant 0 : index
    %1 = vector.load %arg2[%c0_1, %c0_2] : memref<16x1xf32, #tpu.memory_space<vmem>>, vector<16x1xf32>
    %2 = vector.broadcast %1 : vector<16x1xf32> to vector<16x256xf32>
    %3 = arith.mulf %0, %2 : vector<16x256xf32>
    %c0_3 = arith.constant 0 : index
    %c0_4 = arith.constant 0 : index
    %4 = vector.load %arg3[%c0_3, %c0_4] : memref<16x1xf32, #tpu.memory_space<vmem>>, vector<16x1xf32>
    %5 = vector.broadcast %4 : vector<16x1xf32> to vector<16x256xf32>
    %6 = arith.addf %3, %5 : vector<16x256xf32>
    %7 = math.tanh %6 : vector<16x256xf32>
    %c0_5 = arith.constant 0 : index
    %c0_6 = arith.constant 0 : index
    %8 = vector.load %arg4[%c0_5, %c0_6] : memref<16x256xf32, #tpu.memory_space<vmem>>, vector<16x256xf32>
    tpu.vector_store %arg4[%c0_5, %c0_6], %7 {strides = array<i32>} : memref<16x256xf32, #tpu.memory_space<vmem>>, vector<16x256xf32>,
    return
  }
  func.func @transform_0(%arg0: i32) -> (i32, i32) {
    %c0_i32 = arith.constant 0 : i32
    %c0_i32_0 = arith.constant 0 : i32
    return %arg0, %c0_i32 : i32, i32
  }
  func.func @transform_1(%arg0: i32) -> (i32, i32) {
    %c0_i32 = arith.constant 0 : i32
    %c0_i32_0 = arith.constant 0 : i32
    return %arg0, %c0_i32 : i32, i32
  }
  func.func @transform_2(%arg0: i32) -> (i32, i32) {
    %c0_i32 = arith.constant 0 : i32
    %c0_i32_0 = arith.constant 0 : i32
    return %arg0, %c0_i32 : i32, i32
  }
  func.func @transform_3(%arg0: i32) -> (i32, i32) {
    %c0_i32 = arith.constant 0 : i32
    %c0_i32_0 = arith.constant 0 : i32
    return %arg0, %c0_i32 : i32, i32
  }
}

</mosaic_0001>

<bundles_post_ra>
// kernel: gained_function_forward.1
= control target key start
LH: loop header
LB: loop body
LE: loop exit
PB: predicated region body
PF: predicated region fallthrough
CT: control target
= control target key end

     0   :  { %v113_v2 = vmov 0   ;;  %s173_s0 = inlined_call_operand.vmem [shape: f32[16,256], index: 0, kind: input, shape index: {}]   ;;  %s174_s1 = inlined_call_operand.vmem [shape: f32[16,1], index: 1, kind: input, shape index: {}]   ;;  %s175_s2 = inlined_call_operand.vmem [shape: f32[16,1], index: 2, kind: input, shape index: {}]   ;;  %s176_s3 = inlined_call_operand.hbm [shape: f32[16,256], index: 3, kind: output, shape index: {}]  }
   0x1   :  { %v35_v0 = vld [vmem:[%s175_s2] sm:$0xff]  ;;  %80 = vset.pattern.permute.xlu1 %v113_v2  ;;  %79 = vset.pattern.permute.xlu0 %v113_v2 }
   0x2   :  { %v19_v1 = vld [vmem:[%s174_s1] sm:$0xff]  ;;  %39 = vperm.xlu1 %80, %v35_v0  }
   0x3   :  { %23 = vperm.xlu0 %79, %v19_v1  }
   0x4   :  { %8 = vsyncpa [#allocation3], 0  ;;  %v36_v3 = vld [vmem:[%s175_s2 + $0x8] sm:$0xff]  ;;  %v15_v5 = vld [vmem:[%s173_s0] sm:$0xff]  ;;  %s114_s26 = smov [#allocation2]  }
   0x5   :  { %v20_v4 = vld [vmem:[%s174_s1 + $0x8] sm:$0xff]  ;;  %v17_v11 = vld [vmem:[%s173_s0 + $0x10] sm:$0xff]  ;;  %v18_v12 = vld [vmem:[%s173_s0 + $0x18] sm:$0xff]  ;;  %s64_s27 = sshll.u32 %s114_s26, 4  ;;  %s65_s27 = int_to_ptr.vmem [resolvable:$true] %s64_s27 }
   0x6   :  { %44 = vperm.xlu1 %80, %v36_v3   ;;  %v16_v6 = vld [vmem:[%s173_s0 + $0x8] sm:$0xff]  ;;  %s89_s0 = scalar_lea.vmem %s65_s27, 512  ;;  %p94_p1 = scmp.lt.s32.totalorder %s65_s27, %s65_s27 }
   0x7   :  { %28 = vperm.xlu0 %79, %v20_v4   ;;  %p90_p0 = scmp.ne.s32.totalorder %s65_s27, %s89_s0  ;;  %p95_p2 = scmp.lt.s32.totalorder %s89_s0, %s89_s0 }
   0x9   :  { %p96_p3 = por %p95_p2, %p94_p1 }
   0xb   :  { %p97_p4 = pnand %p96_p3, %p90_p0 }
  0x81   :  { %v40_v7 = vpop.permute.xlu1 %39 }
  0x82   :  { %v24_v8 = vpop.permute.xlu0 %23 }
  0x83   :  { %v31_v9 = vmul.f32 %v24_v8, %v15_v5  ;;  %v32_v10 = vmul.f32 %v24_v8, %v16_v6 }
  0x85   :  { %v47_v13 = vadd.f32 %v40_v7, %v31_v9  ;;  %v48_v14 = vadd.f32 %v40_v7, %v32_v10  ;;  %v45_v18 = vpop.permute.xlu1 %44 }
  0x86   :  { %v29_v15 = vpop.permute.xlu0 %28 }
  0x87   :  { %81 = vtanh.f32 %v47_v13  ;;  %v33_v16 = vmul.f32 %v29_v15, %v17_v11  ;;  %v34_v17 = vmul.f32 %v29_v15, %v18_v12 }
  0x88   :  { %83 = vtanh.f32 %v48_v14 }
  0x89   :  { %v49_v19 = vadd.f32 %v45_v18, %v33_v16  ;;  %v50_v20 = vadd.f32 %v45_v18, %v34_v17 }
  0x8b   :  { %85 = vtanh.f32 %v49_v19 }
  0x8c   :  { %87 = vtanh.f32 %v50_v20 }
  0x91   :  { %v82_v21 = vpop.eup %81 }
  0x92   :  { %v84_v22 = vpop.eup %83  ;;  %55 = vst [vmem:[#allocation2] sm:$0xff] %v82_v21 }
  0x93   :  { %56 = vst [vmem:[#allocation2 + $0x8] sm:$0xff] %v84_v22 }
  0x95   :  { %v86_v23 = vpop.eup %85 }
  0x96   :  { %v88_v24 = vpop.eup %87  ;;  %57 = vst [vmem:[#allocation2 + $0x10] sm:$0xff] %v86_v23 }
  0x97   :  { %58 = vst [vmem:[#allocation2 + $0x18] sm:$0xff] %v88_v24 }
  0x98   :  { %100 = shalt.err (!%p97_p4)
}
  0x99   :  { %s101_s30 = scalar_lea.hbm %s176_s3, 512 }
  0x9a   :  { %p102_p5 = scmp.ne.s32.totalorder %s176_s3, %s101_s30  ;;  %p105_p6 = scmp.lt.u32.totalorder %s101_s30, %s176_s3 }
  0x9c   :  { %p107_p7 = pnand %p105_p6, %p102_p5 }
  0x9e   :  { %110 = shalt.err (!%p107_p7)
}
  0x9f   :  { %s115_s8 = smov 256   ;;  %s116_s9 = smov 16  }
  0xa0   :  { %70 = dma.vmem_to_hbm [thread:$0]  %s65_s27, 512, %s176_s3, [#allocation3], %s115_s8, %s115_s8, %s116_s9  }
  0xa1   :  { %111 = dma.done.wait [#allocation3], 512  }
  0xa2   :  { %112 = vsyncadd [#allocation3], 4294966784 }
  0xa3   :  { %74 = vsyncpa [#allocation3], 1 }

</bundles_post_ra>
